<compile_context>
chip_gen: v5e
topology: v5e:2x2
jax: 0.10.0
libtpu: 0.0.40
codegen_flags: <defaults>
</compile_context>

<pallas_src>
import jax
import jax.numpy as jnp
from jax import lax
from jax.experimental import pallas as pl
from jax.experimental.pallas import tpu as pltpu

BAG_BLOCK = 8                    # bags per grid step (raise to 16-32 on v5e/v6e for large B)
NBUF = 8                         # DMA ring depth for the HBM-gather fallback (power of 2)
RESIDENT_VMEM_BUDGET = 24 << 20  # resident-table cap; conservative for v7x's 64 MiB per TC


def _embedding_bag_mean_vmem_kernel(tok_ref, start_ref, end_ref,   # scalar prefetch (SMEM)
                                    emb_ref,                        # (V, Dp) f32, VMEM-resident
                                    out_ref):                       # (BAG_BLOCK, Dp) VMEM block
    bag_block, d = out_ref.shape
    base = pl.program_id(0) * bag_block

    def bag_body(lb, carry):
        b = base + lb
        s = start_ref[b]
        n = end_ref[b] - s                                   # tokens in this bag

        def tok_body(i, acc):
            # Dynamic single-row gather from the VMEM-resident table (vld, no HBM trip).
            return acc + emb_ref[pl.ds(tok_ref[s + i], 1), :]

        acc = lax.fori_loop(0, n, tok_body, jnp.zeros((1, d), jnp.float32))
        inv = 1.0 / jnp.maximum(n, 1).astype(jnp.float32)    # empty/padded bag -> zero row
        out_ref[pl.ds(lb, 1), :] = acc * inv                 # lane-dense dynamic row store
        return carry

    lax.fori_loop(0, bag_block, bag_body, 0, unroll=True)


def _embedding_bag_mean_dma_kernel(tok_ref, start_ref, end_ref,    # scalar prefetch (SMEM)
                                   emb_hbm,                         # (V, Dp) f32, stays in HBM
                                   out_ref,                         # (BAG_BLOCK, Dp) VMEM block
                                   row_buf, pend_ref, sem):         # scratch
    bag_block, d = out_ref.shape
    base = pl.program_id(0) * bag_block

    def fetch(tok, slot):
        # DMA one (1, Dp) embedding row from HBM into ring slot `slot`.
        pend_ref[slot] = tok                                 # remember src row for the wait
        pltpu.make_async_copy(emb_hbm.at[pl.ds(tok, 1)], row_buf.at[slot],
                              sem.at[slot]).start()

    def wait(slot):
        # Rebuild the exact descriptor (same src slice) that was started for this slot.
        pltpu.make_async_copy(emb_hbm.at[pl.ds(pend_ref[slot], 1)], row_buf.at[slot],
                              sem.at[slot]).wait()

    def bag_body(lb, carry):
        b = base + lb
        s = start_ref[b]
        n = end_ref[b] - s                                   # tokens in this bag

        # Prime up to NBUF-1 in-flight row DMAs (slot j <- token j).
        def prime(j, c):
            fetch(tok_ref[s + j], j)
            return c
        lax.fori_loop(0, jnp.minimum(NBUF - 1, n), prime, 0)

        def tok_body(i, acc):
            slot = i & (NBUF - 1)
            nxt = i + NBUF - 1
            # Issue the next row's DMA (and its SMEM token-id read) BEFORE waiting on the
            # current row so consecutive HBM fetches overlap; it targets the slot that was
            # consumed last iteration, so there is no buffer race.
            @pl.when(nxt < n)
            def _():
                fetch(tok_ref[s + nxt], nxt & (NBUF - 1))
            wait(slot)
            return acc + row_buf[slot]                       # VPU accumulate

        acc = lax.fori_loop(0, n, tok_body, jnp.zeros((1, d), jnp.float32))
        inv = 1.0 / jnp.maximum(n, 1).astype(jnp.float32)    # empty/padded bag -> zero row
        out_ref[pl.ds(lb, 1), :] = acc * inv                 # lane-dense dynamic row store
        return carry

    # TODO(synk): the DMA ring still drains at bag boundaries; cross-bag priming (or one
    # flattened token loop per 8-bag block) would hide the per-bag cold-start latency.
    lax.fori_loop(0, bag_block, bag_body, 0, unroll=True)


def text_classification_forward(text, offsets, emb_weight, fc_weight, fc_bias,
                                *, bag_block=BAG_BLOCK,
                                resident_vmem_budget_bytes=RESIDENT_VMEM_BUDGET,
                                force_dma_gather=False):
    """EmbeddingBag(mode='mean')(text, offsets) followed by Linear.

    text: (T,) int flat token ids; offsets: (B,) int bag start indices.
    """
    T = text.shape[0]
    B = offsets.shape[0]
    V, D = emb_weight.shape

    # Lane-dense layout: pad the embedding dim to a multiple of 128 so accumulates and
    # output stores are full-lane vector ops (pure perf; sliced off below).
    d_pad = D if D % 128 == 0 else 128 * pl.cdiv(D, 128)
    emb_p = emb_weight if d_pad == D else jnp.pad(emb_weight, ((0, 0), (0, d_pad - D)))

    b_pad = bag_block * pl.cdiv(B, bag_block)
    pad = b_pad - B

    tok_ids = text.astype(jnp.int32)
    starts = offsets.astype(jnp.int32)
    ends = jnp.concatenate([starts[1:], jnp.array([T], dtype=jnp.int32)])
    # Padded bags are empty (start == end == 0) -> zero rows, sliced off below.
    starts_p = jnp.concatenate([starts, jnp.zeros((pad,), jnp.int32)])
    ends_p = jnp.concatenate([ends, jnp.zeros((pad,), jnp.int32)])

    # TODO(synk): for very large token streams T, chunk tok_ids (or keep them in HBM and
    # DMA per-block slices) instead of scalar-prefetching the whole stream into SMEM.
    # TODO(synk): out-of-range token ids are not range-checked (same contract as
    # nn.EmbeddingBag); callers must pass valid ids.

    grid = (b_pad // bag_block,)
    out_shape = jax.ShapeDtypeStruct((b_pad, d_pad), jnp.float32)
    out_spec = pl.BlockSpec((bag_block, d_pad), lambda g, tok, st, en: (g, 0))

    table_bytes = V * d_pad * 4
    # Budget: table (x2 for pipeline buffering) + output blocks + slack must fit VMEM.
    resident = (not force_dma_gather and
                2 * table_bytes + 4 * bag_block * d_pad * 4 + (1 << 20)
                <= resident_vmem_budget_bytes)

    if resident:
        pooled = pl.pallas_call(
            _embedding_bag_mean_vmem_kernel,
            out_shape=out_shape,
            grid_spec=pltpu.PrefetchScalarGridSpec(
                num_scalar_prefetch=3,                        # tok_ids, starts, ends -> SMEM
                grid=grid,
                in_specs=[pl.BlockSpec((V, d_pad), lambda g, tok, st, en: (0, 0))],
                out_specs=out_spec,
            ),
            compiler_params=pltpu.CompilerParams(
                dimension_semantics=("parallel",),            # bag groups shard across TCs (v7x)
                vmem_limit_bytes=resident_vmem_budget_bytes,  # explicit opt-in above scoped default
            ),
        )(tok_ids, starts_p, ends_p, emb_p)
    else:
        pooled = pl.pallas_call(
            _embedding_bag_mean_dma_kernel,
            out_shape=out_shape,
            grid_spec=pltpu.PrefetchScalarGridSpec(
                num_scalar_prefetch=3,
                grid=grid,
                in_specs=[pl.BlockSpec(memory_space=pl.ANY)],     # table stays in HBM
                out_specs=out_spec,
                scratch_shapes=[
                    pltpu.VMEM((NBUF, 1, d_pad), jnp.float32),    # gathered-row ring buffer
                    pltpu.SMEM((NBUF,), jnp.int32),               # pending src row per slot
                    pltpu.SemaphoreType.DMA((NBUF,)),             # one DMA semaphore per slot
                ],
            ),
            compiler_params=pltpu.CompilerParams(
                dimension_semantics=("parallel",),
            ),
        )(tok_ids, starts_p, ends_p, emb_p)

    # Tiny (B, D) @ (D, C) + bias linear stays in XLA so the Pallas output is lane-dense.
    return pooled[:B, :D] @ fc_weight.T + fc_bias


if __name__ == "__main__":
    # Small synthetic shapes consistent with the module.
    vocab_size = 64
    embed_dim = 32
    num_class = 4
    total_tokens = 12          # T: concatenated token stream
    batch = 3                  # number of bags

    key = jax.random.PRNGKey(0)
    k_emb, k_fc, k_txt = jax.random.split(key, 3)

    # init_weights(): uniform(-0.5, 0.5) for embedding and fc weight, zero bias.
    initrange = 0.5
    emb_weight = jax.random.uniform(
        k_emb, (vocab_size, embed_dim), jnp.float32, -initrange, initrange)
    fc_weight = jax.random.uniform(
        k_fc, (num_class, embed_dim), jnp.float32, -initrange, initrange)
    fc_bias = jnp.zeros((num_class,), jnp.float32)

    # Inputs: flat token ids + per-bag offsets (EmbeddingBag convention).
    text = jax.random.randint(k_txt, (total_tokens,), 0, vocab_size, jnp.int32)
    offsets = jnp.array([0, 5, 9], dtype=jnp.int32)

    # Plain-JAX reference (EmbeddingBag mean + Linear).
    gathered = emb_weight[text]                                   # (T, D)
    ends_ref = jnp.concatenate([offsets[1:], jnp.array([total_tokens], jnp.int32)])
    pooled_ref = jnp.stack([
        jnp.mean(gathered[int(offsets[i]):int(ends_ref[i])], axis=0)
        for i in range(batch)
    ])
    ref = pooled_ref @ fc_weight.T + fc_bias

    # Fast path: VMEM-resident table (auto-selected here; table is tiny).
    out_resident = jax.block_until_ready(
        text_classification_forward(text, offsets, emb_weight, fc_weight, fc_bias))
    # Fallback path: HBM DMA-gather ring (what a huge vocab would use).
    out_dma = jax.block_until_ready(
        text_classification_forward(text, offsets, emb_weight, fc_weight, fc_bias,
                                    force_dma_gather=True))

    assert out_resident.shape == (batch, num_class)
    assert out_dma.shape == (batch, num_class)
    assert jnp.allclose(out_resident, ref, atol=1e-5, rtol=1e-5), (out_resident, ref)
    assert jnp.allclose(out_dma, ref, atol=1e-5, rtol=1e-5), (out_dma, ref)

    print("KERNEL_OK")
</pallas_src>

<mosaic_0001>
module attributes {stable_mosaic.version = 11 : i64} {
  func.func @_embedding_bag_mean_vmem_kernel(%arg0: i32, %arg1: memref<12xi32, #tpu.memory_space<smem>>, %arg2: memref<8xi32, #tpu.memory_space<smem>>, %arg3: memref<8xi32, #tpu.memory_space<smem>>, %arg4: memref<64x128xf32, #tpu.memory_space<vmem>>, %arg5: memref<8x128xf32, #tpu.memory_space<vmem>>) attributes {dimension_semantics = [#tpu.dimension_semantics<parallel>], iteration_bounds = array<i64: 1>, scalar_prefetch = 3 : i64, scratch_operands = 0 : i64, tpu.core_type = #tpu.core_type<tc>, window_params = [{pipeline_mode = #tpu.pipeline_mode<synchronous>, transform_indices = @transform_0, window_bounds = array<i64: 64, 128>}, {transform_indices = @transform_1, window_bounds = array<i64: 8, 128>}]} {
    %c8_i32 = arith.constant 8 : i32
    %0 = arith.muli %arg0, %c8_i32 : i32
    %c0_i32 = arith.constant 0 : i32
    %1 = arith.addi %0, %c0_i32 : i32
    %2 = arith.index_cast %1 : i32 to index
    %3 = memref.load %arg2[%2] : memref<8xi32, #tpu.memory_space<smem>>
    %4 = arith.index_cast %1 : i32 to index
    %5 = memref.load %arg3[%4] : memref<8xi32, #tpu.memory_space<smem>>
    %6 = arith.subi %5, %3 : i32
    %cst = arith.constant 0.000000e+00 : f32
    %7 = vector.broadcast %cst : f32 to vector<1x128xf32>
    %c0_i32_0 = arith.constant 0 : i32
    %8 = arith.subi %6, %c0_i32_0 : i32
    %9 = arith.addi %c0_i32_0, %8 : i32
    %c1_i32 = arith.constant 1 : i32
    %10 = scf.for %arg6 = %c0_i32_0 to %9 step %c1_i32 iter_args(%arg7 = %7) -> (vector<1x128xf32>)  : i32 {
      %137 = arith.addi %3, %arg6 : i32
      %138 = arith.index_cast %137 : i32 to index
      %139 = memref.load %arg1[%138] : memref<12xi32, #tpu.memory_space<smem>>
      %140 = arith.index_cast %139 : i32 to index
      %c0_47 = arith.constant 0 : index
      %141 = vector.load %arg4[%140, %c0_47] : memref<64x128xf32, #tpu.memory_space<vmem>>, vector<1x128xf32>
      %142 = arith.addf %arg7, %141 : vector<1x128xf32>
      scf.yield %142 : vector<1x128xf32>
    }
    %c1_i32_1 = arith.constant 1 : i32
    %11 = arith.maxsi %6, %c1_i32_1 : i32
    %12 = arith.sitofp %11 : i32 to f32
    %cst_2 = arith.constant 1.000000e+00 : f32
    %13 = arith.divf %cst_2, %12 : f32
    %14 = vector.broadcast %13 : f32 to vector<1x128xf32>
    %15 = arith.mulf %10, %14 : vector<1x128xf32>
    %16 = arith.index_cast %c0_i32 : i32 to index
    %c0 = arith.constant 0 : index
    %17 = vector.load %arg5[%16, %c0] : memref<8x128xf32, #tpu.memory_space<vmem>>, vector<1x128xf32>
    tpu.vector_store %arg5[%16, %c0], %15 {strides = array<i32>} : memref<8x128xf32, #tpu.memory_space<vmem>>, vector<1x128xf32>,
    %c1_i32_3 = arith.constant 1 : i32
    %18 = arith.addi %0, %c1_i32_3 : i32
    %19 = arith.index_cast %18 : i32 to index
    %20 = memref.load %arg2[%19] : memref<8xi32, #tpu.memory_space<smem>>
    %21 = arith.index_cast %18 : i32 to index
    %22 = memref.load %arg3[%21] : memref<8xi32, #tpu.memory_space<smem>>
    %23 = arith.subi %22, %20 : i32
    %cst_4 = arith.constant 0.000000e+00 : f32
    %24 = vector.broadcast %cst_4 : f32 to vector<1x128xf32>
    %c0_i32_5 = arith.constant 0 : i32
    %25 = arith.subi %23, %c0_i32_5 : i32
    %26 = arith.addi %c0_i32_5, %25 : i32
    %c1_i32_6 = arith.constant 1 : i32
    %27 = scf.for %arg6 = %c0_i32_5 to %26 step %c1_i32_6 iter_args(%arg7 = %24) -> (vector<1x128xf32>)  : i32 {
      %137 = arith.addi %20, %arg6 : i32
      %138 = arith.index_cast %137 : i32 to index
      %139 = memref.load %arg1[%138] : memref<12xi32, #tpu.memory_space<smem>>
      %140 = arith.index_cast %139 : i32 to index
      %c0_47 = arith.constant 0 : index
      %141 = vector.load %arg4[%140, %c0_47] : memref<64x128xf32, #tpu.memory_space<vmem>>, vector<1x128xf32>
      %142 = arith.addf %arg7, %141 : vector<1x128xf32>
      scf.yield %142 : vector<1x128xf32>
    }
    %c1_i32_7 = arith.constant 1 : i32
    %28 = arith.maxsi %23, %c1_i32_7 : i32
    %29 = arith.sitofp %28 : i32 to f32
    %cst_8 = arith.constant 1.000000e+00 : f32
    %30 = arith.divf %cst_8, %29 : f32
    %31 = vector.broadcast %30 : f32 to vector<1x128xf32>
    %32 = arith.mulf %27, %31 : vector<1x128xf32>
    %33 = arith.index_cast %c1_i32_3 : i32 to index
    %c0_9 = arith.constant 0 : index
    %34 = vector.load %arg5[%33, %c0_9] : memref<8x128xf32, #tpu.memory_space<vmem>>, vector<1x128xf32>
    tpu.vector_store %arg5[%33, %c0_9], %32 {strides = array<i32>} : memref<8x128xf32, #tpu.memory_space<vmem>>, vector<1x128xf32>,
    %c2_i32 = arith.constant 2 : i32
    %35 = arith.addi %0, %c2_i32 : i32
    %36 = arith.index_cast %35 : i32 to index
    %37 = memref.load %arg2[%36] : memref<8xi32, #tpu.memory_space<smem>>
    %38 = arith.index_cast %35 : i32 to index
    %39 = memref.load %arg3[%38] : memref<8xi32, #tpu.memory_space<smem>>
    %40 = arith.subi %39, %37 : i32
    %cst_10 = arith.constant 0.000000e+00 : f32
    %41 = vector.broadcast %cst_10 : f32 to vector<1x128xf32>
    %c0_i32_11 = arith.constant 0 : i32
    %42 = arith.subi %40, %c0_i32_11 : i32
    %43 = arith.addi %c0_i32_11, %42 : i32
    %c1_i32_12 = arith.constant 1 : i32
    %44 = scf.for %arg6 = %c0_i32_11 to %43 step %c1_i32_12 iter_args(%arg7 = %41) -> (vector<1x128xf32>)  : i32 {
      %137 = arith.addi %37, %arg6 : i32
      %138 = arith.index_cast %137 : i32 to index
      %139 = memref.load %arg1[%138] : memref<12xi32, #tpu.memory_space<smem>>
      %140 = arith.index_cast %139 : i32 to index
      %c0_47 = arith.constant 0 : index
      %141 = vector.load %arg4[%140, %c0_47] : memref<64x128xf32, #tpu.memory_space<vmem>>, vector<1x128xf32>
      %142 = arith.addf %arg7, %141 : vector<1x128xf32>
      scf.yield %142 : vector<1x128xf32>
    }
    %c1_i32_13 = arith.constant 1 : i32
    %45 = arith.maxsi %40, %c1_i32_13 : i32
    %46 = arith.sitofp %45 : i32 to f32
    %cst_14 = arith.constant 1.000000e+00 : f32
    %47 = arith.divf %cst_14, %46 : f32
    %48 = vector.broadcast %47 : f32 to vector<1x128xf32>
    %49 = arith.mulf %44, %48 : vector<1x128xf32>
    %50 = arith.index_cast %c2_i32 : i32 to index
    %c0_15 = arith.constant 0 : index
    %51 = vector.load %arg5[%50, %c0_15] : memref<8x128xf32, #tpu.memory_space<vmem>>, vector<1x128xf32>
    tpu.vector_store %arg5[%50, %c0_15], %49 {strides = array<i32>} : memref<8x128xf32, #tpu.memory_space<vmem>>, vector<1x128xf32>,
    %c3_i32 = arith.constant 3 : i32
    %52 = arith.addi %0, %c3_i32 : i32
    %53 = arith.index_cast %52 : i32 to index
    %54 = memref.load %arg2[%53] : memref<8xi32, #tpu.memory_space<smem>>
    %55 = arith.index_cast %52 : i32 to index
    %56 = memref.load %arg3[%55] : memref<8xi32, #tpu.memory_space<smem>>
    %57 = arith.subi %56, %54 : i32
    %cst_16 = arith.constant 0.000000e+00 : f32
    %58 = vector.broadcast %cst_16 : f32 to vector<1x128xf32>
    %c0_i32_17 = arith.constant 0 : i32
    %59 = arith.subi %57, %c0_i32_17 : i32
    %60 = arith.addi %c0_i32_17, %59 : i32
    %c1_i32_18 = arith.constant 1 : i32
    %61 = scf.for %arg6 = %c0_i32_17 to %60 step %c1_i32_18 iter_args(%arg7 = %58) -> (vector<1x128xf32>)  : i32 {
      %137 = arith.addi %54, %arg6 : i32
      %138 = arith.index_cast %137 : i32 to index
      %139 = memref.load %arg1[%138] : memref<12xi32, #tpu.memory_space<smem>>
      %140 = arith.index_cast %139 : i32 to index
      %c0_47 = arith.constant 0 : index
      %141 = vector.load %arg4[%140, %c0_47] : memref<64x128xf32, #tpu.memory_space<vmem>>, vector<1x128xf32>
      %142 = arith.addf %arg7, %141 : vector<1x128xf32>
      scf.yield %142 : vector<1x128xf32>
    }
    %c1_i32_19 = arith.constant 1 : i32
    %62 = arith.maxsi %57, %c1_i32_19 : i32
    %63 = arith.sitofp %62 : i32 to f32
    %cst_20 = arith.constant 1.000000e+00 : f32
    %64 = arith.divf %cst_20, %63 : f32
    %65 = vector.broadcast %64 : f32 to vector<1x128xf32>
    %66 = arith.mulf %61, %65 : vector<1x128xf32>
    %67 = arith.index_cast %c3_i32 : i32 to index
    %c0_21 = arith.constant 0 : index
    %68 = vector.load %arg5[%67, %c0_21] : memref<8x128xf32, #tpu.memory_space<vmem>>, vector<1x128xf32>
    tpu.vector_store %arg5[%67, %c0_21], %66 {strides = array<i32>} : memref<8x128xf32, #tpu.memory_space<vmem>>, vector<1x128xf32>,
    %c4_i32 = arith.constant 4 : i32
    %69 = arith.addi %0, %c4_i32 : i32
    %70 = arith.index_cast %69 : i32 to index
    %71 = memref.load %arg2[%70] : memref<8xi32, #tpu.memory_space<smem>>
    %72 = arith.index_cast %69 : i32 to index
    %73 = memref.load %arg3[%72] : memref<8xi32, #tpu.memory_space<smem>>
    %74 = arith.subi %73, %71 : i32
    %cst_22 = arith.constant 0.000000e+00 : f32
    %75 = vector.broadcast %cst_22 : f32 to vector<1x128xf32>
    %c0_i32_23 = arith.constant 0 : i32
    %76 = arith.subi %74, %c0_i32_23 : i32
    %77 = arith.addi %c0_i32_23, %76 : i32
    %c1_i32_24 = arith.constant 1 : i32
    %78 = scf.for %arg6 = %c0_i32_23 to %77 step %c1_i32_24 iter_args(%arg7 = %75) -> (vector<1x128xf32>)  : i32 {
      %137 = arith.addi %71, %arg6 : i32
      %138 = arith.index_cast %137 : i32 to index
      %139 = memref.load %arg1[%138] : memref<12xi32, #tpu.memory_space<smem>>
      %140 = arith.index_cast %139 : i32 to index
      %c0_47 = arith.constant 0 : index
      %141 = vector.load %arg4[%140, %c0_47] : memref<64x128xf32, #tpu.memory_space<vmem>>, vector<1x128xf32>
      %142 = arith.addf %arg7, %141 : vector<1x128xf32>
      scf.yield %142 : vector<1x128xf32>
    }
    %c1_i32_25 = arith.constant 1 : i32
    %79 = arith.maxsi %74, %c1_i32_25 : i32
    %80 = arith.sitofp %79 : i32 to f32
    %cst_26 = arith.constant 1.000000e+00 : f32
    %81 = arith.divf %cst_26, %80 : f32
    %82 = vector.broadcast %81 : f32 to vector<1x128xf32>
    %83 = arith.mulf %78, %82 : vector<1x128xf32>
    %84 = arith.index_cast %c4_i32 : i32 to index
    %c0_27 = arith.constant 0 : index
    %85 = vector.load %arg5[%84, %c0_27] : memref<8x128xf32, #tpu.memory_space<vmem>>, vector<1x128xf32>
    tpu.vector_store %arg5[%84, %c0_27], %83 {strides = array<i32>} : memref<8x128xf32, #tpu.memory_space<vmem>>, vector<1x128xf32>,
    %c5_i32 = arith.constant 5 : i32
    %86 = arith.addi %0, %c5_i32 : i32
    %87 = arith.index_cast %86 : i32 to index
    %88 = memref.load %arg2[%87] : memref<8xi32, #tpu.memory_space<smem>>
    %89 = arith.index_cast %86 : i32 to index
    %90 = memref.load %arg3[%89] : memref<8xi32, #tpu.memory_space<smem>>
    %91 = arith.subi %90, %88 : i32
    %cst_28 = arith.constant 0.000000e+00 : f32
    %92 = vector.broadcast %cst_28 : f32 to vector<1x128xf32>
    %c0_i32_29 = arith.constant 0 : i32
    %93 = arith.subi %91, %c0_i32_29 : i32
    %94 = arith.addi %c0_i32_29, %93 : i32
    %c1_i32_30 = arith.constant 1 : i32
    %95 = scf.for %arg6 = %c0_i32_29 to %94 step %c1_i32_30 iter_args(%arg7 = %92) -> (vector<1x128xf32>)  : i32 {
      %137 = arith.addi %88, %arg6 : i32
      %138 = arith.index_cast %137 : i32 to index
      %139 = memref.load %arg1[%138] : memref<12xi32, #tpu.memory_space<smem>>
      %140 = arith.index_cast %139 : i32 to index
      %c0_47 = arith.constant 0 : index
      %141 = vector.load %arg4[%140, %c0_47] : memref<64x128xf32, #tpu.memory_space<vmem>>, vector<1x128xf32>
      %142 = arith.addf %arg7, %141 : vector<1x128xf32>
      scf.yield %142 : vector<1x128xf32>
    }
    %c1_i32_31 = arith.constant 1 : i32
    %96 = arith.maxsi %91, %c1_i32_31 : i32
    %97 = arith.sitofp %96 : i32 to f32
    %cst_32 = arith.constant 1.000000e+00 : f32
    %98 = arith.divf %cst_32, %97 : f32
    %99 = vector.broadcast %98 : f32 to vector<1x128xf32>
    %100 = arith.mulf %95, %99 : vector<1x128xf32>
    %101 = arith.index_cast %c5_i32 : i32 to index
    %c0_33 = arith.constant 0 : index
    %102 = vector.load %arg5[%101, %c0_33] : memref<8x128xf32, #tpu.memory_space<vmem>>, vector<1x128xf32>
    tpu.vector_store %arg5[%101, %c0_33], %100 {strides = array<i32>} : memref<8x128xf32, #tpu.memory_space<vmem>>, vector<1x128xf32>,
    %c6_i32 = arith.constant 6 : i32
    %103 = arith.addi %0, %c6_i32 : i32
    %104 = arith.index_cast %103 : i32 to index
    %105 = memref.load %arg2[%104] : memref<8xi32, #tpu.memory_space<smem>>
    %106 = arith.index_cast %103 : i32 to index
    %107 = memref.load %arg3[%106] : memref<8xi32, #tpu.memory_space<smem>>
    %108 = arith.subi %107, %105 : i32
    %cst_34 = arith.constant 0.000000e+00 : f32
    %109 = vector.broadcast %cst_34 : f32 to vector<1x128xf32>
    %c0_i32_35 = arith.constant 0 : i32
    %110 = arith.subi %108, %c0_i32_35 : i32
    %111 = arith.addi %c0_i32_35, %110 : i32
    %c1_i32_36 = arith.constant 1 : i32
    %112 = scf.for %arg6 = %c0_i32_35 to %111 step %c1_i32_36 iter_args(%arg7 = %109) -> (vector<1x128xf32>)  : i32 {
      %137 = arith.addi %105, %arg6 : i32
      %138 = arith.index_cast %137 : i32 to index
      %139 = memref.load %arg1[%138] : memref<12xi32, #tpu.memory_space<smem>>
      %140 = arith.index_cast %139 : i32 to index
      %c0_47 = arith.constant 0 : index
      %141 = vector.load %arg4[%140, %c0_47] : memref<64x128xf32, #tpu.memory_space<vmem>>, vector<1x128xf32>
      %142 = arith.addf %arg7, %141 : vector<1x128xf32>
      scf.yield %142 : vector<1x128xf32>
    }
    %c1_i32_37 = arith.constant 1 : i32
    %113 = arith.maxsi %108, %c1_i32_37 : i32
    %114 = arith.sitofp %113 : i32 to f32
    %cst_38 = arith.constant 1.000000e+00 : f32
    %115 = arith.divf %cst_38, %114 : f32
    %116 = vector.broadcast %115 : f32 to vector<1x128xf32>
    %117 = arith.mulf %112, %116 : vector<1x128xf32>
    %118 = arith.index_cast %c6_i32 : i32 to index
    %c0_39 = arith.constant 0 : index
    %119 = vector.load %arg5[%118, %c0_39] : memref<8x128xf32, #tpu.memory_space<vmem>>, vector<1x128xf32>
    tpu.vector_store %arg5[%118, %c0_39], %117 {strides = array<i32>} : memref<8x128xf32, #tpu.memory_space<vmem>>, vector<1x128xf32>,
    %c7_i32 = arith.constant 7 : i32
    %120 = arith.addi %0, %c7_i32 : i32
    %121 = arith.index_cast %120 : i32 to index
    %122 = memref.load %arg2[%121] : memref<8xi32, #tpu.memory_space<smem>>
    %123 = arith.index_cast %120 : i32 to index
    %124 = memref.load %arg3[%123] : memref<8xi32, #tpu.memory_space<smem>>
    %125 = arith.subi %124, %122 : i32
    %cst_40 = arith.constant 0.000000e+00 : f32
    %126 = vector.broadcast %cst_40 : f32 to vector<1x128xf32>
    %c0_i32_41 = arith.constant 0 : i32
    %127 = arith.subi %125, %c0_i32_41 : i32
    %128 = arith.addi %c0_i32_41, %127 : i32
    %c1_i32_42 = arith.constant 1 : i32
    %129 = scf.for %arg6 = %c0_i32_41 to %128 step %c1_i32_42 iter_args(%arg7 = %126) -> (vector<1x128xf32>)  : i32 {
      %137 = arith.addi %122, %arg6 : i32
      %138 = arith.index_cast %137 : i32 to index
      %139 = memref.load %arg1[%138] : memref<12xi32, #tpu.memory_space<smem>>
      %140 = arith.index_cast %139 : i32 to index
      %c0_47 = arith.constant 0 : index
      %141 = vector.load %arg4[%140, %c0_47] : memref<64x128xf32, #tpu.memory_space<vmem>>, vector<1x128xf32>
      %142 = arith.addf %arg7, %141 : vector<1x128xf32>
      scf.yield %142 : vector<1x128xf32>
    }
    %c1_i32_43 = arith.constant 1 : i32
    %130 = arith.maxsi %125, %c1_i32_43 : i32
    %131 = arith.sitofp %130 : i32 to f32
    %cst_44 = arith.constant 1.000000e+00 : f32
    %132 = arith.divf %cst_44, %131 : f32
    %133 = vector.broadcast %132 : f32 to vector<1x128xf32>
    %134 = arith.mulf %129, %133 : vector<1x128xf32>
    %135 = arith.index_cast %c7_i32 : i32 to index
    %c0_45 = arith.constant 0 : index
    %136 = vector.load %arg5[%135, %c0_45] : memref<8x128xf32, #tpu.memory_space<vmem>>, vector<1x128xf32>
    tpu.vector_store %arg5[%135, %c0_45], %134 {strides = array<i32>} : memref<8x128xf32, #tpu.memory_space<vmem>>, vector<1x128xf32>,
    %c8_i32_46 = arith.constant 8 : i32
    return
  }
  func.func @transform_0(%arg0: i32, %arg1: memref<12xi32, #tpu.memory_space<smem>>, %arg2: memref<8xi32, #tpu.memory_space<smem>>, %arg3: memref<8xi32, #tpu.memory_space<smem>>) -> (i32, i32) {
    %c0_i32 = arith.constant 0 : i32
    %c0_i32_0 = arith.constant 0 : i32
    %c0_i32_1 = arith.constant 0 : i32
    return %c0_i32, %c0_i32_0 : i32, i32
  }
  func.func @transform_1(%arg0: i32, %arg1: memref<12xi32, #tpu.memory_space<smem>>, %arg2: memref<8xi32, #tpu.memory_space<smem>>, %arg3: memref<8xi32, #tpu.memory_space<smem>>) -> (i32, i32) {
    %c0_i32 = arith.constant 0 : i32
    %c0_i32_0 = arith.constant 0 : i32
    return %arg0, %c0_i32 : i32, i32
  }
}

</mosaic_0001>

<bundles_post_ra>
// kernel: tpu_custom_call.1
= control target key start
LH: loop header
LB: loop body
LE: loop exit
PB: predicated region body
PF: predicated region fallthrough
CT: control target
= control target key end

     0   :  { %s974_s21 = smov [#allocation3]   ;;  %s975_s22 = smov [#allocation4]   ;;  %s1091_s0 = inlined_call_operand.hbm [shape: s32[12], index: 0, kind: input, shape index: {}]   ;;  %s1092_s3 = inlined_call_operand.hbm [shape: f32[64,128], index: 3, kind: input, shape index: {}]   ;;  %s1093_s4 = inlined_call_operand.hbm [shape: f32[8,128], index: 4, kind: output, shape index: {}]   ;;  %s1094_s1 = inlined_call_operand.hbm [shape: s32[8], index: 1, kind: input, shape index: {}]   ;;  %s1095_s2 = inlined_call_operand.vmem [shape: s32[8], index: 2, kind: input, shape index: {}]  }
   0x1   :  { %s10_s17 = sshll.u32 %s1091_s0, 4  ;;  %s15_s20 = sshll.u32 %s1094_s1, 4  ;;  %s11_s17 = int_to_ptr.hbm [resolvable:$true] %s10_s17  ;;  %s16_s20 = int_to_ptr.hbm [resolvable:$true] %s15_s20 }
   0x2   :  { %13 = dma.hbm_to_smem %s11_s17, 16, %s974_s21, [#allocation2] }
   0x3   :  { %18 = dma.hbm_to_smem %s16_s20, 16, %s975_s22, [#allocation2] }
   0x4   :  { %s20_s25 = sshll.u32 %s1095_s2, 4  ;;  %s976_s26 = smov [#allocation5]   ;;  %s21_s25 = int_to_ptr.vmem [resolvable:$true] %s20_s25 }
   0x5   :  { %23 = dma.vmem_to_smem %s21_s25, 16, %s976_s26, [#allocation2] }
   0x6   :  { %872 = dma.done.wait [#allocation2], 48 }
   0x7   :  { %873 = vsyncadd [#allocation2], 4294967248 }
   0x8   :  { %26 = sfence }
   0x9   :  { %27 = vsyncpa [#allocation7], 0 }
   0xa   :  { %28 = vsyncpa [#allocation8], 0  ;;  %s33_s27 = sshll.u32 %s1092_s3, 4  ;;  %s977_s28 = smov [#allocation6]   ;;  %s34_s27 = int_to_ptr.hbm [resolvable:$true] %s33_s27 }
   0xb   :  { %s35_s29 = sshll.u32 %s977_s28, 4  ;;  %s978_s30 = smov 128   ;;  %s36_s29 = int_to_ptr.vmem [resolvable:$true] %s35_s29 }
   0xc   :  { %s979_s5 = smov 8  }
   0xd   :  { %41 = dma.hbm_to_vmem [thread:$0]  %s34_s27, 1024, %s36_s29, [#allocation7], %s978_s30, %s978_s30, %s979_s5  }
   0xe   :  { %874 = dma.done.wait [#allocation7], 1024  }
   0xf   :  { %875 = vsyncadd [#allocation7], 4294966272  ;;  %s47_s2 = sld [smem:[#allocation4]]  ;;  %v886_v0 = vmov 0.0  }
  0x10   :  { %s48_s6 = sld [smem:[#allocation5]] }
  0x16   :  { %s49_s7 = ssub.s32 %s48_s6, %s47_s2 }
  0x17   :  { %p439_p0 = scmp.le.s32.totalorder %s49_s7, 0 }
  0x18   :  { %s882_s8 = smov (!%p439_p0), 0  }
  0x19   :  { %378 = sbr.rel (%p439_p0) target bundleno = 43 (0x2b), region = 86 }
  0x1e   :  { %v878_v1 = vmov 0.0  }
  0x1f LB: > { %s57_s3 = sadd.s32 %s884_s8, %s47_s2  ;;  %s53_s8 = sadd.s32 1, %s884_s8   ;;  %s884_s8 = sphi %s882_s8, %s53_s8   ;;  %v880_v1 = vphi %v878_v1, %v879_v1  }
  0x20   : > { %s58_s9 = sld [smem:[#allocation3 + %s57_s3]]  ;;  %p52_p1 = scmp.ge.s32.totalorder %s53_s8, %s49_s7 }
  0x26   : > { %s59_s10 = scalar_lea.vmem [#allocation6], %s58_s9  ;;  %55 = sbr.rel (!%p52_p1) target bundleno = 31 (0x1f), region = 92 }
  0x27   : > { %v60_v2 = vld [vmem:[%s59_s10] sm:$0x1] }
  0x28   : > { %v61_v3 = vadd.f32 %v880_v1, %v60_v2  }
  0x2a   : > { %v879_v1 = vmov %v61_v3   ;;  %v887_v0 = vmov (%p52_p1), %v61_v3  }
  0x2b PF:  { %p62_p2 = scmp.gt.s32.totalorder %s49_s7, 1  ;;  %s1018_s11 = sld [smem:[#allocation4 + $0x1]]  ;;  %v898_v17 = vmov 0.0   ;;  %v888_v0 = vphi %v886_v0, %v887_v0  }
  0x2c   :  { %s441_s12 = sld [smem:[#allocation5 + $0x1]] }
  0x2d   :  { %s1097_s7 = smov (!%p62_p2, %s49_s7), 1 }
  0x2e   :  { %s64_s13 = scvt.s32.f32 %s1097_s7 }
  0x30   :  { %v65_v4 = vstv %s64_s13 }
  0x31   :  { %676 = vrcp.f32 %v65_v4  ;;  %v77_v7 = vand.u32 2147483648, %v65_v4  ;;  %vm71_vm0 = vweird.f32 %v65_v4  ;;  %v75_v9 = vand.u32 2147483647, %v65_v4 }
  0x32   :  { %s1021_s14 = ssub.s32 %s441_s12, %s1018_s11 }
  0x33   :  { %v78_v11 = vor.u32 1.1754944e-38, %v77_v7  ;;  %vm76_vm3 = vcmp.eq.f32.partialorder %v75_v9, 8.507059e+37  ;;  %p442_p3 = scmp.le.s32.totalorder %s1021_s14, 0 }
  0x34   :  { %s894_s16 = smov (!%p442_p3), 0  }
  0x37   :  { %v677_v5 = vpop.eup %676 }
  0x38   :  { %v67_v6 = vmul.f32 %v677_v5, %v65_v4  ;;  %vm72_vm1 = vweird.f32 %v677_v5 }
  0x39   :  { %vm73_vm2 = vmor %vm71_vm0, %vm72_vm1 }
  0x3a   :  { %v68_v8 = vsub.f32 1.0, %v67_v6 }
  0x3c   :  { %v69_v10 = vmul.f32 %v677_v5, %v68_v8 }
  0x3e   :  { %v70_v12 = vadd.f32 %v677_v5, %v69_v10 }
  0x40   :  { %v74_v13 = vsel %vm73_vm2, %v677_v5, %v70_v12 }
  0x41   :  { %v79_v14 = vsel %vm76_vm3, %v78_v11, %v74_v13 }
  0x42   :  { %461 = vpush %v79_v14 }
  0x73   :  { %s462_s15 = spop %461  ;;  %386 = sbr.rel (%p442_p3) target bundleno = 133 (0x85), region = 97 }
  0x74   :  { %v81_v15 = vstv %s462_s15 }
  0x75   :  { %v82_v16 = vmul.f32 %v888_v0, %v81_v15 }
  0x77   :  { %83 = vst [vmem:[#allocation9] sm:$0x1] %v82_v16 }
  0x78   :  { %v890_v18 = vmov 0.0  }
  0x79 LB: > { %s95_s17 = sadd.s32 %s896_s16, %s1018_s11  ;;  %s91_s16 = sadd.s32 1, %s896_s16   ;;  %s896_s16 = sphi %s894_s16, %s91_s16   ;;  %v892_v18 = vphi %v890_v18, %v891_v18  }
  0x7a   : > { %s96_s18 = sld [smem:[#allocation3 + %s95_s17]]  ;;  %p90_p4 = scmp.ge.s32.totalorder %s91_s16, %s1021_s14 }
  0x80   : > { %s97_s19 = scalar_lea.vmem [#allocation6], %s96_s18  ;;  %93 = sbr.rel (!%p90_p4) target bundleno = 121 (0x79), region = 103 }
  0x81   : > { %v98_v19 = vld [vmem:[%s97_s19] sm:$0x1] }
  0x82   : > { %v99_v20 = vadd.f32 %v892_v18, %v98_v19  }
  0x84   : > { %v891_v18 = vmov %v99_v20   ;;  %v899_v17 = vmov (%p90_p4), %v99_v20  }
  0x85 PF:  { %p100_p5 = scmp.gt.s32.totalorder %s1021_s14, 1  ;;  %s1027_s20 = sld [smem:[#allocation4 + $0x2]]  ;;  %v910_v34 = vmov 0.0   ;;  %v900_v17 = vphi %v898_v17, %v899_v17  }
  0x86   :  { %s444_s21 = sld [smem:[#allocation5 + $0x2]] }
  0x87   :  { %s1099_s14 = smov (!%p100_p5, %s1021_s14), 1 }
  0x88   :  { %s102_s22 = scvt.s32.f32 %s1099_s14 }
  0x8a   :  { %v103_v21 = vstv %s102_s22 }
  0x8b   :  { %678 = vrcp.f32 %v103_v21  ;;  %v115_v24 = vand.u32 2147483648, %v103_v21  ;;  %vm109_vm4 = vweird.f32 %v103_v21  ;;  %v113_v26 = vand.u32 2147483647, %v103_v21 }
  0x8c   :  { %s1031_s23 = ssub.s32 %s444_s21, %s1027_s20 }
  0x8d   :  { %v116_v28 = vor.u32 1.1754944e-38, %v115_v24  ;;  %vm114_vm7 = vcmp.eq.f32.partialorder %v113_v26, 8.507059e+37  ;;  %p445_p6 = scmp.le.s32.totalorder %s1031_s23, 0 }
  0x8e   :  { %s906_s25 = smov (!%p445_p6), 0  }
  0x91   :  { %v679_v22 = vpop.eup %678 }
  0x92   :  { %v105_v23 = vmul.f32 %v679_v22, %v103_v21  ;;  %vm110_vm5 = vweird.f32 %v679_v22 }
  0x93   :  { %vm111_vm6 = vmor %vm109_vm4, %vm110_vm5 }
  0x94   :  { %v106_v25 = vsub.f32 1.0, %v105_v23 }
  0x96   :  { %v107_v27 = vmul.f32 %v679_v22, %v106_v25 }
  0x98   :  { %v108_v29 = vadd.f32 %v679_v22, %v107_v27 }
  0x9a   :  { %v112_v30 = vsel %vm111_vm6, %v679_v22, %v108_v29 }
  0x9b   :  { %v117_v31 = vsel %vm114_vm7, %v116_v28, %v112_v30 }
  0x9c   :  { %463 = vpush %v117_v31 }
  0xcd   :  { %s464_s24 = spop %463  ;;  %394 = sbr.rel (%p445_p6) target bundleno = 223 (0xdf), region = 108 }
  0xce   :  { %v119_v32 = vstv %s464_s24 }
  0xcf   :  { %v120_v33 = vmul.f32 %v900_v17, %v119_v32 }
  0xd1   :  { %121 = vst [vmem:[#allocation9 + $0x1] sm:$0x1] %v120_v33 }
  0xd2   :  { %v902_v35 = vmov 0.0  }
  0xd3 LB: > { %s133_s26 = sadd.s32 %s908_s25, %s1027_s20  ;;  %s129_s25 = sadd.s32 1, %s908_s25   ;;  %s908_s25 = sphi %s906_s25, %s129_s25   ;;  %v904_v35 = vphi %v902_v35, %v903_v35  }
  0xd4   : > { %s134_s0 = sld [smem:[#allocation3 + %s133_s26]]  ;;  %p128_p7 = scmp.ge.s32.totalorder %s129_s25, %s1031_s23 }
  0xda   : > { %s135_s1 = scalar_lea.vmem [#allocation6], %s134_s0  ;;  %131 = sbr.rel (!%p128_p7) target bundleno = 211 (0xd3), region = 114 }
  0xdb   : > { %v136_v36 = vld [vmem:[%s135_s1] sm:$0x1] }
  0xdc   : > { %v137_v37 = vadd.f32 %v904_v35, %v136_v36  }
  0xde   : > { %v903_v35 = vmov %v137_v37   ;;  %v911_v34 = vmov (%p128_p7), %v137_v37  }
  0xdf PF:  { %p138_p8 = scmp.gt.s32.totalorder %s1031_s23, 1  ;;  %s1037_s27 = sld [smem:[#allocation4 + $0x3]]  ;;  %v922_v51 = vmov 0.0   ;;  %v912_v34 = vphi %v910_v34, %v911_v34  }
  0xe0   :  { %s447_s28 = sld [smem:[#allocation5 + $0x3]] }
  0xe1   :  { %s1101_s23 = smov (!%p138_p8, %s1031_s23), 1 }
  0xe2   :  { %s140_s29 = scvt.s32.f32 %s1101_s23 }
  0xe4   :  { %v141_v38 = vstv %s140_s29 }
  0xe5   :  { %680 = vrcp.f32 %v141_v38  ;;  %v153_v41 = vand.u32 2147483648, %v141_v38  ;;  %vm147_vm8 = vweird.f32 %v141_v38  ;;  %v151_v43 = vand.u32 2147483647, %v141_v38 }
  0xe6   :  { %s1041_s30 = ssub.s32 %s447_s28, %s1037_s27 }
  0xe7   :  { %v154_v45 = vor.u32 1.1754944e-38, %v153_v41  ;;  %vm152_vm11 = vcmp.eq.f32.partialorder %v151_v43, 8.507059e+37  ;;  %p448_p9 = scmp.le.s32.totalorder %s1041_s30, 0 }
  0xe8   :  { %s918_s2 = smov (!%p448_p9), 0  }
  0xeb   :  { %v681_v39 = vpop.eup %680 }
  0xec   :  { %v143_v40 = vmul.f32 %v681_v39, %v141_v38  ;;  %vm148_vm9 = vweird.f32 %v681_v39 }
  0xed   :  { %vm149_vm10 = vmor %vm147_vm8, %vm148_vm9 }
  0xee   :  { %v144_v42 = vsub.f32 1.0, %v143_v40 }
  0xf0   :  { %v145_v44 = vmul.f32 %v681_v39, %v144_v42 }
  0xf2   :  { %v146_v46 = vadd.f32 %v681_v39, %v145_v44 }
  0xf4   :  { %v150_v47 = vsel %vm149_vm10, %v681_v39, %v146_v46 }
  0xf5   :  { %v155_v48 = vsel %vm152_vm11, %v154_v45, %v150_v47 }
  0xf6   :  { %465 = vpush %v155_v48 }
 0x127   :  { %s466_s5 = spop %465  ;;  %402 = sbr.rel (%p448_p9) target bundleno = 313 (0x139), region = 119 }
 0x128   :  { %v157_v49 = vstv %s466_s5 }
 0x129   :  { %v158_v50 = vmul.f32 %v912_v34, %v157_v49 }
 0x12b   :  { %159 = vst [vmem:[#allocation9 + $0x2] sm:$0x1] %v158_v50 }
 0x12c   :  { %v914_v52 = vmov 0.0  }
 0x12d LB: > { %s171_s6 = sadd.s32 %s920_s2, %s1037_s27  ;;  %s167_s2 = sadd.s32 1, %s920_s2   ;;  %s920_s2 = sphi %s918_s2, %s167_s2   ;;  %v916_v52 = vphi %v914_v52, %v915_v52  }
 0x12e   : > { %s172_s7 = sld [smem:[#allocation3 + %s171_s6]]  ;;  %p166_p10 = scmp.ge.s32.totalorder %s167_s2, %s1041_s30 }
 0x134   : > { %s173_s8 = scalar_lea.vmem [#allocation6], %s172_s7  ;;  %169 = sbr.rel (!%p166_p10) target bundleno = 301 (0x12d), region = 125 }
 0x135   : > { %v174_v53 = vld [vmem:[%s173_s8] sm:$0x1] }
 0x136   : > { %v175_v54 = vadd.f32 %v916_v52, %v174_v53  }
 0x138   : > { %v915_v52 = vmov %v175_v54   ;;  %v923_v51 = vmov (%p166_p10), %v175_v54  }
 0x139 PF:  { %p176_p11 = scmp.gt.s32.totalorder %s1041_s30, 1  ;;  %s1047_s3 = sld [smem:[#allocation4 + $0x4]]  ;;  %v934_v4 = vmov 0.0   ;;  %v924_v51 = vphi %v922_v51, %v923_v51  }
 0x13a   :  { %s450_s9 = sld [smem:[#allocation5 + $0x4]] }
 0x13b   :  { %s1103_s30 = smov (!%p176_p11, %s1041_s30), 1 }
 0x13c   :  { %s178_s10 = scvt.s32.f32 %s1103_s30 }
 0x13e   :  { %v179_v55 = vstv %s178_s10 }
 0x13f   :  { %682 = vrcp.f32 %v179_v55  ;;  %v191_v58 = vand.u32 2147483648, %v179_v55  ;;  %vm185_vm12 = vweird.f32 %v179_v55  ;;  %v189_v60 = vand.u32 2147483647, %v179_v55 }
 0x140   :  { %s1051_s11 = ssub.s32 %s450_s9, %s1047_s3 }
 0x141   :  { %v192_v62 = vor.u32 1.1754944e-38, %v191_v58  ;;  %vm190_vm15 = vcmp.eq.f32.partialorder %v189_v60, 8.507059e+37  ;;  %p451_p12 = scmp.le.s32.totalorder %s1051_s11, 0 }
 0x142   :  { %s930_s13 = smov (!%p451_p12), 0  }
 0x145   :  { %v683_v56 = vpop.eup %682 }
 0x146   :  { %v181_v57 = vmul.f32 %v683_v56, %v179_v55  ;;  %vm186_vm13 = vweird.f32 %v683_v56 }
 0x147   :  { %vm187_vm14 = vmor %vm185_vm12, %vm186_vm13 }
 0x148   :  { %v182_v59 = vsub.f32 1.0, %v181_v57 }
 0x14a   :  { %v183_v61 = vmul.f32 %v683_v56, %v182_v59 }
 0x14c   :  { %v184_v63 = vadd.f32 %v683_v56, %v183_v61 }
 0x14e   :  { %v188_v0 = vsel %vm187_vm14, %v683_v56, %v184_v63 }
 0x14f   :  { %v193_v1 = vsel %vm190_vm15, %v192_v62, %v188_v0 }
 0x150   :  { %467 = vpush %v193_v1 }
 0x181   :  { %s468_s12 = spop %467  ;;  %410 = sbr.rel (%p451_p12) target bundleno = 403 (0x193), region = 130 }
 0x182   :  { %v195_v2 = vstv %s468_s12 }
 0x183   :  { %v196_v3 = vmul.f32 %v924_v51, %v195_v2 }
 0x185   :  { %197 = vst [vmem:[#allocation9 + $0x3] sm:$0x1] %v196_v3 }
 0x186   :  { %v926_v5 = vmov 0.0  }
 0x187 LB: > { %s209_s14 = sadd.s32 %s932_s13, %s1047_s3  ;;  %s205_s13 = sadd.s32 1, %s932_s13   ;;  %s932_s13 = sphi %s930_s13, %s205_s13   ;;  %v928_v5 = vphi %v926_v5, %v927_v5  }
 0x188   : > { %s210_s15 = sld [smem:[#allocation3 + %s209_s14]]  ;;  %p204_p13 = scmp.ge.s32.totalorder %s205_s13, %s1051_s11 }
 0x18e   : > { %s211_s16 = scalar_lea.vmem [#allocation6], %s210_s15  ;;  %207 = sbr.rel (!%p204_p13) target bundleno = 391 (0x187), region = 136 }
 0x18f   : > { %v212_v6 = vld [vmem:[%s211_s16] sm:$0x1] }
 0x190   : > { %v213_v7 = vadd.f32 %v928_v5, %v212_v6  }
 0x192   : > { %v927_v5 = vmov %v213_v7   ;;  %v935_v4 = vmov (%p204_p13), %v213_v7  }
 0x193 PF:  { %p214_p0 = scmp.gt.s32.totalorder %s1051_s11, 1  ;;  %s1057_s17 = sld [smem:[#allocation4 + $0x5]]  ;;  %v946_v21 = vmov 0.0   ;;  %v936_v4 = vphi %v934_v4, %v935_v4  }
 0x194   :  { %s453_s18 = sld [smem:[#allocation5 + $0x5]] }
 0x195   :  { %s1105_s11 = smov (!%p214_p0, %s1051_s11), 1 }
 0x196   :  { %s216_s19 = scvt.s32.f32 %s1105_s11 }
 0x198   :  { %v217_v8 = vstv %s216_s19 }
 0x199   :  { %684 = vrcp.f32 %v217_v8  ;;  %v229_v11 = vand.u32 2147483648, %v217_v8  ;;  %vm223_vm0 = vweird.f32 %v217_v8  ;;  %v227_v13 = vand.u32 2147483647, %v217_v8 }
 0x19a   :  { %s1061_s20 = ssub.s32 %s453_s18, %s1057_s17 }
 0x19b   :  { %v230_v15 = vor.u32 1.1754944e-38, %v229_v11  ;;  %vm228_vm3 = vcmp.eq.f32.partialorder %v227_v13, 8.507059e+37  ;;  %p454_p1 = scmp.le.s32.totalorder %s1061_s20, 0 }
 0x19c   :  { %s942_s22 = smov (!%p454_p1), 0  }
 0x19f   :  { %v685_v9 = vpop.eup %684 }
 0x1a0   :  { %v219_v10 = vmul.f32 %v685_v9, %v217_v8  ;;  %vm224_vm1 = vweird.f32 %v685_v9 }
 0x1a1   :  { %vm225_vm2 = vmor %vm223_vm0, %vm224_vm1 }
 0x1a2   :  { %v220_v12 = vsub.f32 1.0, %v219_v10 }
 0x1a4   :  { %v221_v14 = vmul.f32 %v685_v9, %v220_v12 }
 0x1a6   :  { %v222_v16 = vadd.f32 %v685_v9, %v221_v14 }
 0x1a8   :  { %v226_v17 = vsel %vm225_vm2, %v685_v9, %v222_v16 }
 0x1a9   :  { %v231_v18 = vsel %vm228_vm3, %v230_v15, %v226_v17 }
 0x1aa   :  { %469 = vpush %v231_v18 }
 0x1db   :  { %s470_s21 = spop %469  ;;  %418 = sbr.rel (%p454_p1) target bundleno = 493 (0x1ed), region = 141 }
 0x1dc   :  { %v233_v19 = vstv %s470_s21 }
 0x1dd   :  { %v234_v20 = vmul.f32 %v936_v4, %v233_v19 }
 0x1df   :  { %235 = vst [vmem:[#allocation9 + $0x4] sm:$0x1] %v234_v20 }
 0x1e0   :  { %v938_v22 = vmov 0.0  }
 0x1e1 LB: > { %s247_s23 = sadd.s32 %s944_s22, %s1057_s17  ;;  %s243_s22 = sadd.s32 1, %s944_s22   ;;  %s944_s22 = sphi %s942_s22, %s243_s22   ;;  %v940_v22 = vphi %v938_v22, %v939_v22  }
 0x1e2   : > { %s248_s24 = sld [smem:[#allocation3 + %s247_s23]]  ;;  %p242_p2 = scmp.ge.s32.totalorder %s243_s22, %s1061_s20 }
 0x1e8   : > { %s249_s25 = scalar_lea.vmem [#allocation6], %s248_s24  ;;  %245 = sbr.rel (!%p242_p2) target bundleno = 481 (0x1e1), region = 147 }
 0x1e9   : > { %v250_v23 = vld [vmem:[%s249_s25] sm:$0x1] }
 0x1ea   : > { %v251_v24 = vadd.f32 %v940_v22, %v250_v23  }
 0x1ec   : > { %v939_v22 = vmov %v251_v24   ;;  %v947_v21 = vmov (%p242_p2), %v251_v24  }
 0x1ed PF:  { %p252_p3 = scmp.gt.s32.totalorder %s1061_s20, 1  ;;  %s1067_s26 = sld [smem:[#allocation4 + $0x6]]  ;;  %v958_v38 = vmov 0.0   ;;  %v948_v21 = vphi %v946_v21, %v947_v21  }
 0x1ee   :  { %s456_s0 = sld [smem:[#allocation5 + $0x6]] }
 0x1ef   :  { %s1107_s20 = smov (!%p252_p3, %s1061_s20), 1 }
 0x1f0   :  { %s254_s1 = scvt.s32.f32 %s1107_s20 }
 0x1f2   :  { %v255_v25 = vstv %s254_s1 }
 0x1f3   :  { %686 = vrcp.f32 %v255_v25  ;;  %v267_v28 = vand.u32 2147483648, %v255_v25  ;;  %vm261_vm4 = vweird.f32 %v255_v25  ;;  %v265_v30 = vand.u32 2147483647, %v255_v25 }
 0x1f4   :  { %s1071_s27 = ssub.s32 %s456_s0, %s1067_s26 }
 0x1f5   :  { %v268_v32 = vor.u32 1.1754944e-38, %v267_v28  ;;  %vm266_vm7 = vcmp.eq.f32.partialorder %v265_v30, 8.507059e+37  ;;  %p457_p4 = scmp.le.s32.totalorder %s1071_s27, 0 }
 0x1f6   :  { %s954_s29 = smov (!%p457_p4), 0  }
 0x1f9   :  { %v687_v26 = vpop.eup %686 }
 0x1fa   :  { %v257_v27 = vmul.f32 %v687_v26, %v255_v25  ;;  %vm262_vm5 = vweird.f32 %v687_v26 }
 0x1fb   :  { %vm263_vm6 = vmor %vm261_vm4, %vm262_vm5 }
 0x1fc   :  { %v258_v29 = vsub.f32 1.0, %v257_v27 }
 0x1fe   :  { %v259_v31 = vmul.f32 %v687_v26, %v258_v29 }
 0x200   :  { %v260_v33 = vadd.f32 %v687_v26, %v259_v31 }
 0x202   :  { %v264_v34 = vsel %vm263_vm6, %v687_v26, %v260_v33 }
 0x203   :  { %v269_v35 = vsel %vm266_vm7, %v268_v32, %v264_v34 }
 0x204   :  { %471 = vpush %v269_v35 }
 0x235   :  { %s472_s28 = spop %471  ;;  %426 = sbr.rel (%p457_p4) target bundleno = 583 (0x247), region = 152 }
 0x236   :  { %v271_v36 = vstv %s472_s28 }
 0x237   :  { %v272_v37 = vmul.f32 %v948_v21, %v271_v36 }
 0x239   :  { %273 = vst [vmem:[#allocation9 + $0x5] sm:$0x1] %v272_v37 }
 0x23a   :  { %v950_v39 = vmov 0.0  }
 0x23b LB: > { %s285_s30 = sadd.s32 %s956_s29, %s1067_s26  ;;  %s281_s29 = sadd.s32 1, %s956_s29   ;;  %s956_s29 = sphi %s954_s29, %s281_s29   ;;  %v952_v39 = vphi %v950_v39, %v951_v39  }
 0x23c   : > { %s286_s5 = sld [smem:[#allocation3 + %s285_s30]]  ;;  %p280_p5 = scmp.ge.s32.totalorder %s281_s29, %s1071_s27 }
 0x242   : > { %s287_s2 = scalar_lea.vmem [#allocation6], %s286_s5  ;;  %283 = sbr.rel (!%p280_p5) target bundleno = 571 (0x23b), region = 158 }
 0x243   : > { %v288_v40 = vld [vmem:[%s287_s2] sm:$0x1] }
 0x244   : > { %v289_v41 = vadd.f32 %v952_v39, %v288_v40  }
 0x246   : > { %v951_v39 = vmov %v289_v41   ;;  %v959_v38 = vmov (%p280_p5), %v289_v41  }
 0x247 PF:  { %p290_p6 = scmp.gt.s32.totalorder %s1071_s27, 1  ;;  %s1077_s6 = sld [smem:[#allocation4 + $0x7]]  ;;  %v970_v55 = vmov 0.0   ;;  %v960_v38 = vphi %v958_v38, %v959_v38  }
 0x248   :  { %s459_s7 = sld [smem:[#allocation5 + $0x7]] }
 0x249   :  { %s1109_s27 = smov (!%p290_p6, %s1071_s27), 1 }
 0x24a   :  { %s292_s8 = scvt.s32.f32 %s1109_s27 }
 0x24c   :  { %v293_v42 = vstv %s292_s8 }
 0x24d   :  { %688 = vrcp.f32 %v293_v42  ;;  %v305_v45 = vand.u32 2147483648, %v293_v42  ;;  %vm299_vm8 = vweird.f32 %v293_v42  ;;  %v303_v47 = vand.u32 2147483647, %v293_v42 }
 0x24e   :  { %s1081_s3 = ssub.s32 %s459_s7, %s1077_s6 }
 0x24f   :  { %v306_v49 = vor.u32 1.1754944e-38, %v305_v45  ;;  %vm304_vm11 = vcmp.eq.f32.partialorder %v303_v47, 8.507059e+37  ;;  %p460_p7 = scmp.le.s32.totalorder %s1081_s3, 0 }
 0x250   :  { %s966_s10 = smov (!%p460_p7), 0  }
 0x253   :  { %v689_v43 = vpop.eup %688 }
 0x254   :  { %v295_v44 = vmul.f32 %v689_v43, %v293_v42  ;;  %vm300_vm9 = vweird.f32 %v689_v43 }
 0x255   :  { %vm301_vm10 = vmor %vm299_vm8, %vm300_vm9 }
 0x256   :  { %v296_v46 = vsub.f32 1.0, %v295_v44 }
 0x258   :  { %v297_v48 = vmul.f32 %v689_v43, %v296_v46 }
 0x25a   :  { %v298_v50 = vadd.f32 %v689_v43, %v297_v48 }
 0x25c   :  { %v302_v51 = vsel %vm301_vm10, %v689_v43, %v298_v50 }
 0x25d   :  { %v307_v52 = vsel %vm304_vm11, %v306_v49, %v302_v51 }
 0x25e   :  { %473 = vpush %v307_v52 }
 0x28f   :  { %s474_s9 = spop %473  ;;  %434 = sbr.rel (%p460_p7) target bundleno = 673 (0x2a1), region = 163 }
 0x290   :  { %v309_v53 = vstv %s474_s9 }
 0x291   :  { %v310_v54 = vmul.f32 %v960_v38, %v309_v53 }
 0x293   :  { %311 = vst [vmem:[#allocation9 + $0x6] sm:$0x1] %v310_v54 }
 0x294   :  { %v962_v56 = vmov 0.0  }
 0x295 LB: > { %s323_s11 = sadd.s32 %s968_s10, %s1077_s6  ;;  %s319_s10 = sadd.s32 1, %s968_s10   ;;  %s968_s10 = sphi %s966_s10, %s319_s10   ;;  %v964_v56 = vphi %v962_v56, %v963_v56  }
 0x296   : > { %s324_s12 = sld [smem:[#allocation3 + %s323_s11]]  ;;  %p318_p8 = scmp.ge.s32.totalorder %s319_s10, %s1081_s3 }
 0x29c   : > { %s325_s13 = scalar_lea.vmem [#allocation6], %s324_s12  ;;  %321 = sbr.rel (!%p318_p8) target bundleno = 661 (0x295), region = 169 }
 0x29d   : > { %v326_v57 = vld [vmem:[%s325_s13] sm:$0x1] }
 0x29e   : > { %v327_v58 = vadd.f32 %v964_v56, %v326_v57  }
 0x2a0   : > { %v963_v56 = vmov %v327_v58   ;;  %v971_v55 = vmov (%p318_p8), %v327_v58  }
 0x2a1 PF:  { %p328_p9 = scmp.gt.s32.totalorder %s1081_s3, 1  ;;  %s980_s15 = smov [#allocation9]   ;;  %v972_v55 = vphi %v970_v55, %v971_v55  }
 0x2a2   :  { %s355_s16 = sshll.u32 %s980_s15, 4  ;;  %s357_s19 = sshll.u32 %s1093_s4, 4  ;;  %s356_s16 = int_to_ptr.vmem [resolvable:$true] %s355_s16  ;;  %s358_s19 = int_to_ptr.hbm [resolvable:$true] %s357_s19 }
 0x2a3   :  { %s1111_s3 = smov (!%p328_p9, %s1081_s3), 1 }
 0x2a4   :  { %s330_s14 = scvt.s32.f32 %s1111_s3 }
 0x2a6   :  { %v331_v59 = vstv %s330_s14 }
 0x2a7   :  { %690 = vrcp.f32 %v331_v59  ;;  %v343_v62 = vand.u32 2147483648, %v331_v59  ;;  %vm337_vm12 = vweird.f32 %v331_v59  ;;  %v341_v0 = vand.u32 2147483647, %v331_v59 }
 0x2a9   :  { %v344_v2 = vor.u32 1.1754944e-38, %v343_v62  ;;  %vm342_vm15 = vcmp.eq.f32.partialorder %v341_v0, 8.507059e+37 }
 0x2ad   :  { %v691_v60 = vpop.eup %690 }
 0x2ae   :  { %v333_v61 = vmul.f32 %v691_v60, %v331_v59  ;;  %vm338_vm13 = vweird.f32 %v691_v60 }
 0x2af   :  { %vm339_vm14 = vmor %vm337_vm12, %vm338_vm13 }
 0x2b0   :  { %v334_v63 = vsub.f32 1.0, %v333_v61 }
 0x2b2   :  { %v335_v1 = vmul.f32 %v691_v60, %v334_v63 }
 0x2b4   :  { %v336_v3 = vadd.f32 %v691_v60, %v335_v1 }
 0x2b6   :  { %v340_v4 = vsel %vm339_vm14, %v691_v60, %v336_v3 }
 0x2b7   :  { %v345_v5 = vsel %vm342_vm15, %v344_v2, %v340_v4 }
 0x2b8   :  { %475 = vpush %v345_v5 }
 0x2e9   :  { %s476_s20 = spop %475 }
 0x2ea   :  { %v347_v6 = vstv %s476_s20 }
 0x2eb   :  { %v348_v7 = vmul.f32 %v972_v55, %v347_v6 }
 0x2ed   :  { %349 = vst [vmem:[#allocation9 + $0x7] sm:$0x1] %v348_v7 }
 0x2ee   :  { %360 = dma.vmem_to_hbm [thread:$0]  %s356_s16, 128, %s358_s19, [#allocation8]  }
 0x2ef   :  { %876 = dma.done.wait [#allocation8], 128  }
 0x2f0   :  { %877 = vsyncadd [#allocation8], 4294967168 }
 0x2f1   :  { %365 = vsyncpa [#allocation7], 1 }
 0x2f2   :  { %366 = vsyncpa [#allocation8], 1 }

</bundles_post_ra>
